<compile_context>
chip_gen: v7x
topology: tpu7x:2x2x1
jax: 0.10.0
libtpu: 0.0.40
codegen_flags: <defaults>
</compile_context>

<pallas_src>
import jax
import jax.numpy as jnp
from jax.experimental import pallas as pl
from jax.experimental.pallas import tpu as pltpu

INL, HL1, HL2, OUTL = 4, 8, 9, 3
PAD = 128      # lane-dense width for the hidden layers (weights resident in VMEM)
TB_CAP = 1024  # max batch rows per grid step


def mlp_kernel(x_ref, w1_ref, b1_ref, w2_ref, b2_ref, w3_ref, b3_ref, o_ref):
    # One batch tile per grid step; weights/biases are whole-array, VMEM-resident.
    x = x_ref[...]
    h1 = jnp.maximum(
        jnp.dot(x, w1_ref[...], preferred_element_type=jnp.float32) + b1_ref[...], 0.0)
    h2 = jnp.maximum(
        jnp.dot(h1, w2_ref[...], preferred_element_type=jnp.float32) + b2_ref[...], 0.0)
    out = jnp.maximum(
        jnp.dot(h2, w3_ref[...], preferred_element_type=jnp.float32) + b3_ref[...], 0.0)
    o_ref[...] = out.astype(o_ref.dtype)   # (TB, OUTL): narrow store, tiny bytes


def _pad_to(a, shape):
    return jnp.pad(a, [(0, t - s) for s, t in zip(a.shape, shape)])


def _round_up(n, m):
    return ((n + m - 1) // m) * m


def prepare_params(w1, b1, w2, b2, w3, b3):
    """Pad params once (hoisted out of the per-call path).

    Hidden layers are padded to 128 lanes; zero-padded weight columns/rows and
    zero bias lanes keep padded lanes exactly 0 through ReLU. The last layer is
    padded only along its input (rows), so the output stays OUTL wide.
    """
    w1_p = _pad_to(w1, (INL, PAD))
    b1_p = _pad_to(b1, (1, PAD))
    w2_p = _pad_to(w2, (PAD, PAD))
    b2_p = _pad_to(b2, (1, PAD))
    w3_p = _pad_to(w3, (PAD, OUTL))
    b3_p = b3.reshape(1, OUTL)
    return (w1_p, b1_p, w2_p, b2_p, w3_p, b3_p)


def _xla_forward(x, params):
    w1_p, b1_p, w2_p, b2_p, w3_p, b3_p = params
    h1 = jnp.maximum(x @ w1_p + b1_p, 0.0)
    h2 = jnp.maximum(h1 @ w2_p + b2_p, 0.0)
    return jnp.maximum(h2 @ w3_p + b3_p, 0.0)


def mlp_forward(x, params):
    w1_p, b1_p, w2_p, b2_p, w3_p, b3_p = params
    B = x.shape[0]

    # Batch tile: big enough to amortize per-step overhead, small enough that
    # the grid has >= 2 steps (v7x dual-TC sharding), capped at TB_CAP.
    tb = min(TB_CAP, max(8, _round_up((B + 1) // 2, 8)))
    n_steps = pl.cdiv(B, tb)

    if n_steps <= 1:
        # Tiny batch: a 1-step grid has no pipelining / TC sharding; plain XLA
        # fusion of three small matmuls wins.
        return _xla_forward(x, params)

    const = lambda i: (0, 0)
    return pl.pallas_call(
        mlp_kernel,
        out_shape=jax.ShapeDtypeStruct((B, OUTL), jnp.float32),
        grid=(n_steps,),
        in_specs=[
            pl.BlockSpec((tb, INL), lambda i: (i, 0)),   # x: streamed over batch
            pl.BlockSpec((INL, PAD), const),             # w1 (VMEM-resident)
            pl.BlockSpec((1, PAD), const),               # b1
            pl.BlockSpec((PAD, PAD), const),             # w2
            pl.BlockSpec((1, PAD), const),               # b2
            pl.BlockSpec((PAD, OUTL), const),            # w3 (narrow output)
            pl.BlockSpec((1, OUTL), const),              # b3
        ],
        out_specs=pl.BlockSpec((tb, OUTL), lambda i: (i, 0)),
        compiler_params=pltpu.CompilerParams(
            dimension_semantics=("parallel",)),
    )(x, w1_p, b1_p, w2_p, b2_p, w3_p, b3_p)


def init_linear(key, fan_in, fan_out):
    # PyTorch nn.Linear default init: U(-1/sqrt(fan_in), 1/sqrt(fan_in)),
    # stored [in_features, out_features] so the kernel computes x @ W + b.
    kw, kb = jax.random.split(key)
    bound = 1.0 / jnp.sqrt(fan_in)
    w = jax.random.uniform(kw, (fan_in, fan_out), jnp.float32, -bound, bound)
    b = jax.random.uniform(kb, (1, fan_out), jnp.float32, -bound, bound)
    return w, b


def reference(x, w1, b1, w2, b2, w3, b3):
    h1 = jnp.maximum(x @ w1 + b1, 0.0)
    h2 = jnp.maximum(h1 @ w2 + b2, 0.0)
    return jnp.maximum(h2 @ w3 + b3, 0.0)


if __name__ == "__main__":
    key = jax.random.PRNGKey(0)
    kx1, kx2, kx3, k1, k2, k3 = jax.random.split(key, 6)

    w1, b1 = init_linear(k1, INL, HL1)
    w2, b2 = init_linear(k2, HL1, HL2)
    w3, b3 = init_linear(k3, HL2, OUTL)
    params = prepare_params(w1, b1, w2, b2, w3, b3)

    # 1) Pallas path, even batch (2 grid steps -> pipelined, dual-TC on v7x).
    x = jax.random.normal(kx1, (256, INL), jnp.float32)
    out = jax.block_until_ready(mlp_forward(x, params))
    ref = reference(x, w1, b1, w2, b2, w3, b3)
    assert out.shape == (256, OUTL), out.shape
    assert jnp.allclose(out, ref, atol=1e-5, rtol=1e-5), "mismatch (B=256)"

    # 2) Pallas path, ragged last block (no wrapper-side batch padding).
    x = jax.random.normal(kx2, (200, INL), jnp.float32)
    out = jax.block_until_ready(mlp_forward(x, params))
    ref = reference(x, w1, b1, w2, b2, w3, b3)
    assert out.shape == (200, OUTL), out.shape
    assert jnp.allclose(out, ref, atol=1e-5, rtol=1e-5), "mismatch (B=200)"

    # 3) Tiny-batch dispatch path (plain XLA fusion).
    x = jax.random.normal(kx3, (8, INL), jnp.float32)
    out = jax.block_until_ready(mlp_forward(x, params))
    ref = reference(x, w1, b1, w2, b2, w3, b3)
    assert out.shape == (8, OUTL), out.shape
    assert jnp.allclose(out, ref, atol=1e-5, rtol=1e-5), "mismatch (B=8)"

    print("KERNEL_OK")
</pallas_src>

<mosaic_0001>
module attributes {stable_mosaic.version = 11 : i64} {
  func.func @mlp_kernel(%arg0: i32, %arg1: memref<128x4xf32, #tpu.memory_space<vmem>>, %arg2: memref<4x128xf32, #tpu.memory_space<vmem>>, %arg3: memref<1x128xf32, #tpu.memory_space<vmem>>, %arg4: memref<128x128xf32, #tpu.memory_space<vmem>>, %arg5: memref<1x128xf32, #tpu.memory_space<vmem>>, %arg6: memref<128x3xf32, #tpu.memory_space<vmem>>, %arg7: memref<1x3xf32, #tpu.memory_space<vmem>>, %arg8: memref<128x3xf32, #tpu.memory_space<vmem>>) attributes {dimension_semantics = [#tpu.dimension_semantics<parallel>], iteration_bounds = array<i64: 2>, scalar_prefetch = 0 : i64, scratch_operands = 0 : i64, tpu.core_type = #tpu.core_type<tc>, window_params = [{transform_indices = @transform_0, window_bounds = array<i64: 128, 4>}, {pipeline_mode = #tpu.pipeline_mode<synchronous>, transform_indices = @transform_1, window_bounds = array<i64: 4, 128>}, {pipeline_mode = #tpu.pipeline_mode<synchronous>, transform_indices = @transform_2, window_bounds = array<i64: 1, 128>}, {pipeline_mode = #tpu.pipeline_mode<synchronous>, transform_indices = @transform_3, window_bounds = array<i64: 128, 128>}, {pipeline_mode = #tpu.pipeline_mode<synchronous>, transform_indices = @transform_4, window_bounds = array<i64: 1, 128>}, {pipeline_mode = #tpu.pipeline_mode<synchronous>, transform_indices = @transform_5, window_bounds = array<i64: 128, 3>}, {pipeline_mode = #tpu.pipeline_mode<synchronous>, transform_indices = @transform_6, window_bounds = array<i64: 1, 3>}, {transform_indices = @transform_7, window_bounds = array<i64: 128, 3>}]} {
    %c0 = arith.constant 0 : index
    %c0_0 = arith.constant 0 : index
    %0 = vector.load %arg1[%c0, %c0_0] : memref<128x4xf32, #tpu.memory_space<vmem>>, vector<128x4xf32>
    %c0_1 = arith.constant 0 : index
    %c0_2 = arith.constant 0 : index
    %1 = vector.load %arg2[%c0_1, %c0_2] : memref<4x128xf32, #tpu.memory_space<vmem>>, vector<4x128xf32>
    %cst = arith.constant dense<0.000000e+00> : vector<128x128xf32>
    %2 = tpu.matmul %0, %1, %cst {dimension_numbers = #tpu.dot_dimension_numbers<[1], [0], [0], [1], [0, 0, 1, 1], [], []>} : vector<128x4xf32>, vector<4x128xf32>, vector<128x128xf32> -> vector<128x128xf32>
    %c0_3 = arith.constant 0 : index
    %c0_4 = arith.constant 0 : index
    %3 = vector.load %arg3[%c0_3, %c0_4] : memref<1x128xf32, #tpu.memory_space<vmem>>, vector<1x128xf32>
    %4 = vector.broadcast %3 : vector<1x128xf32> to vector<128x128xf32>
    %5 = arith.addf %2, %4 : vector<128x128xf32>
    %cst_5 = arith.constant 0.000000e+00 : f32
    %6 = vector.broadcast %cst_5 : f32 to vector<128x128xf32>
    %7 = arith.maximumf %5, %6 : vector<128x128xf32>
    %c0_6 = arith.constant 0 : index
    %c0_7 = arith.constant 0 : index
    %8 = vector.load %arg4[%c0_6, %c0_7] : memref<128x128xf32, #tpu.memory_space<vmem>>, vector<128x128xf32>
    %cst_8 = arith.constant dense<0.000000e+00> : vector<128x128xf32>
    %9 = tpu.matmul %7, %8, %cst_8 {dimension_numbers = #tpu.dot_dimension_numbers<[1], [0], [0], [1], [0, 0, 1, 1], [], []>} : vector<128x128xf32>, vector<128x128xf32>, vector<128x128xf32> -> vector<128x128xf32>
    %c0_9 = arith.constant 0 : index
    %c0_10 = arith.constant 0 : index
    %10 = vector.load %arg5[%c0_9, %c0_10] : memref<1x128xf32, #tpu.memory_space<vmem>>, vector<1x128xf32>
    %11 = vector.broadcast %10 : vector<1x128xf32> to vector<128x128xf32>
    %12 = arith.addf %9, %11 : vector<128x128xf32>
    %cst_11 = arith.constant 0.000000e+00 : f32
    %13 = vector.broadcast %cst_11 : f32 to vector<128x128xf32>
    %14 = arith.maximumf %12, %13 : vector<128x128xf32>
    %c0_12 = arith.constant 0 : index
    %c0_13 = arith.constant 0 : index
    %15 = vector.load %arg6[%c0_12, %c0_13] : memref<128x3xf32, #tpu.memory_space<vmem>>, vector<128x3xf32>
    %cst_14 = arith.constant dense<0.000000e+00> : vector<128x3xf32>
    %16 = tpu.matmul %14, %15, %cst_14 {dimension_numbers = #tpu.dot_dimension_numbers<[1], [0], [0], [1], [0, 0, 1, 1], [], []>} : vector<128x128xf32>, vector<128x3xf32>, vector<128x3xf32> -> vector<128x3xf32>
    %c0_15 = arith.constant 0 : index
    %c0_16 = arith.constant 0 : index
    %17 = vector.load %arg7[%c0_15, %c0_16] : memref<1x3xf32, #tpu.memory_space<vmem>>, vector<1x3xf32>
    %18 = vector.broadcast %17 : vector<1x3xf32> to vector<128x3xf32>
    %19 = arith.addf %16, %18 : vector<128x3xf32>
    %cst_17 = arith.constant 0.000000e+00 : f32
    %20 = vector.broadcast %cst_17 : f32 to vector<128x3xf32>
    %21 = arith.maximumf %19, %20 : vector<128x3xf32>
    %c0_18 = arith.constant 0 : index
    %c0_19 = arith.constant 0 : index
    %22 = vector.load %arg8[%c0_18, %c0_19] : memref<128x3xf32, #tpu.memory_space<vmem>>, vector<128x3xf32>
    tpu.vector_store %arg8[%c0_18, %c0_19], %21 {strides = array<i32>} : memref<128x3xf32, #tpu.memory_space<vmem>>, vector<128x3xf32>,
    return
  }
  func.func @transform_0(%arg0: i32) -> (i32, i32) {
    %c0_i32 = arith.constant 0 : i32
    %c0_i32_0 = arith.constant 0 : i32
    return %arg0, %c0_i32 : i32, i32
  }
  func.func @transform_1(%arg0: i32) -> (i32, i32) {
    %c0_i32 = arith.constant 0 : i32
    %c0_i32_0 = arith.constant 0 : i32
    %c0_i32_1 = arith.constant 0 : i32
    return %c0_i32, %c0_i32_0 : i32, i32
  }
  func.func @transform_2(%arg0: i32) -> (i32, i32) {
    %c0_i32 = arith.constant 0 : i32
    %c0_i32_0 = arith.constant 0 : i32
    %c0_i32_1 = arith.constant 0 : i32
    return %c0_i32, %c0_i32_0 : i32, i32
  }
  func.func @transform_3(%arg0: i32) -> (i32, i32) {
    %c0_i32 = arith.constant 0 : i32
    %c0_i32_0 = arith.constant 0 : i32
    %c0_i32_1 = arith.constant 0 : i32
    return %c0_i32, %c0_i32_0 : i32, i32
  }
  func.func @transform_4(%arg0: i32) -> (i32, i32) {
    %c0_i32 = arith.constant 0 : i32
    %c0_i32_0 = arith.constant 0 : i32
    %c0_i32_1 = arith.constant 0 : i32
    return %c0_i32, %c0_i32_0 : i32, i32
  }
  func.func @transform_5(%arg0: i32) -> (i32, i32) {
    %c0_i32 = arith.constant 0 : i32
    %c0_i32_0 = arith.constant 0 : i32
    %c0_i32_1 = arith.constant 0 : i32
    return %c0_i32, %c0_i32_0 : i32, i32
  }
  func.func @transform_6(%arg0: i32) -> (i32, i32) {
    %c0_i32 = arith.constant 0 : i32
    %c0_i32_0 = arith.constant 0 : i32
    %c0_i32_1 = arith.constant 0 : i32
    return %c0_i32, %c0_i32_0 : i32, i32
  }
  func.func @transform_7(%arg0: i32) -> (i32, i32) {
    %c0_i32 = arith.constant 0 : i32
    %c0_i32_0 = arith.constant 0 : i32
    return %arg0, %c0_i32 : i32, i32
  }
}

</mosaic_0001>

<bundles_post_ra>
// kernel: tpu_custom_call.1
= control target key start
LH: loop header
LB: loop body
LE: loop exit
PB: predicated region body
PF: predicated region fallthrough
CT: control target
= control target key end

     0   :  { %s1331_s24 = smov 0   ;;  %s1531_s0 = inlined_call_operand.vmem [shape: f32[256,4], index: 0, kind: input, shape index: {}]   ;;  %s1532_s1 = inlined_call_operand.vmem [shape: f32[4,128], index: 1, kind: input, shape index: {}]   ;;  %s1533_s2 = inlined_call_operand.vmem [shape: f32[1,128], index: 2, kind: input, shape index: {}]   ;;  %s1534_s3 = inlined_call_operand.vmem [shape: f32[128,128], index: 3, kind: input, shape index: {}]   ;;  %s1535_s4 = inlined_call_operand.vmem [shape: f32[1,128], index: 4, kind: input, shape index: {}]   ;;  %s1536_s5 = inlined_call_operand.vmem [shape: f32[128,3], index: 5, kind: input, shape index: {}]   ;;  %s1537_s6 = inlined_call_operand.vmem [shape: f32[1,3], index: 6, kind: input, shape index: {}]   ;;  %s1538_s7 = inlined_call_operand.vmem [shape: f32[256,3], index: 7, kind: output, shape index: {}]  }
   0x1 LB: > { %s961_s25 = sadd.s32 4294967295, %s1289_s24   ;;  %p965_p0 = scmp.ge.s32.totalorder %s1289_s24, 1  ;;  %s1289_s24 = sphi %s1331_s24, %s17_s24  }
   0x2   : > { %p238_p1 = scmp.lt.s32.totalorder %s1289_s24, 3 }
   0x4   : > { %p239_p2 = pnand %p965_p0, %p238_p1 }
   0x5   : > { %v298_v0 = vld [vmem:[%s1532_s1] sm:$0xf] (!%p239_p2)  ;;  %vm355_vm0 = vcmask (!%p239_p2), 1043456   ;;  %s966_s28 = sshll.u32 (!%p239_p2), %s961_s25, 4  ;;  %v521_v2 = vld [vmem:[%s1534_s3 + $0x8] sm:$0xff] (!%p239_p2)  ;;  %v522_v3 = vld [vmem:[%s1534_s3 + $0x10] sm:$0xff] (!%p239_p2) }
   0x6   : > { %242 = sbr.rel (%p239_p2) target bundleno = 700 (0x2bc), region = 48  ;;  %v520_v1 = vld [vmem:[%s1534_s3] sm:$0xff] (!%p239_p2)  ;;  %1073 = vmatprep.subr.msk.mxu0 (!%p239_p2), %vm355_vm0, %v298_v0  ;;  %p271_p3 = scmp.lt.s32.totalorder (!%p239_p2), %s966_s28, 31  ;;  %v523_v4 = vld [vmem:[%s1534_s3 + $0x18] sm:$0xff] (!%p239_p2)  ;;  %v525_v8 = vld [vmem:[%s1534_s3 + $0x28] sm:$0xff] (!%p239_p2)  ;;  %vm306_vm1 = vcmask (!%p239_p2), 31744  }
   0x7   : > { %1074 = vmatpush3.msk.msra.mxu0 (!%p239_p2), %vm355_vm0, %v298_v0  ;;  %v1211_v5 = vpack.c.bf16 (!%p239_p2), %v521_v2, %v520_v1  ;;  %v1215_v6 = vpack.c.bf16 (!%p239_p2), %v523_v4, %v522_v3  ;;  %v524_v7 = vld [vmem:[%s1534_s3 + $0x20] sm:$0xff] (!%p239_p2)  ;;  %v526_v10 = vld [vmem:[%s1534_s3 + $0x30] sm:$0xff] (!%p239_p2)  ;;  %v527_v11 = vld [vmem:[%s1534_s3 + $0x38] sm:$0xff] (!%p239_p2)  ;;  %vm888_vm2 = vcmask (!%p239_p2), 23552  }
   0x8   : > { %v1219_v9 = vpack.c.bf16 (!%p239_p2), %v525_v8, %v524_v7  ;;  %v1223_v16 = vpack.c.bf16 (!%p239_p2), %v527_v11, %v526_v10  ;;  %v528_v18 = vld [vmem:[%s1534_s3 + $0x40] sm:$0xff] (!%p239_p2)  ;;  %v529_v19 = vld [vmem:[%s1534_s3 + $0x48] sm:$0xff] (!%p239_p2)  ;;  %v530_v23 = vld [vmem:[%s1534_s3 + $0x50] sm:$0xff] (!%p239_p2) }
   0x9   : > { %1212 = vmatprep.subr.bf16.mxu1 (!%p239_p2), %v1211_v5  ;;  %v1227_v21 = vpack.c.bf16 (!%p239_p2), %v529_v19, %v528_v18  ;;  %v531_v24 = vld [vmem:[%s1534_s3 + $0x58] sm:$0xff] (!%p239_p2)  ;;  %v532_v28 = vld [vmem:[%s1534_s3 + $0x60] sm:$0xff] (!%p239_p2)  ;;  %v533_v29 = vld [vmem:[%s1534_s3 + $0x68] sm:$0xff] (!%p239_p2) }
   0xa   : > { %1214 = vmatpush3.bf16.msra.mxu1 (!%p239_p2), %v1211_v5  ;;  %v1231_v26 = vpack.c.bf16 (!%p239_p2), %v531_v24, %v530_v23  ;;  %v1235_v31 = vpack.c.bf16 (!%p239_p2), %v533_v29, %v532_v28  ;;  %v534_v38 = vld [vmem:[%s1534_s3 + $0x70] sm:$0xff] (!%p239_p2)  ;;  %v535_v39 = vld [vmem:[%s1534_s3 + $0x78] sm:$0xff] (!%p239_p2)  ;;  %v704_v41 = vld [vmem:[%s1536_s5] sm:$0xff] (!%p239_p2) }
   0xb   : > { %1216 = vmatprep.subr.bf16.mxu1 (!%p239_p2), %v1215_v6  ;;  %v1239_v40 = vpack.c.bf16 (!%p239_p2), %v535_v39, %v534_v38  ;;  %v705_v42 = vld [vmem:[%s1536_s5 + $0x8] sm:$0xff] (!%p239_p2)  ;;  %v706_v43 = vld [vmem:[%s1536_s5 + $0x10] sm:$0xff] (!%p239_p2)  ;;  %v707_v45 = vld [vmem:[%s1536_s5 + $0x18] sm:$0xff] (!%p239_p2) }
   0xc   : > { %v1243_v44 = vpack.c.bf16 (!%p239_p2), %v705_v42, %v704_v41  ;;  %v1247_v46 = vpack.c.bf16 (!%p239_p2), %v707_v45, %v706_v43  ;;  %v708_v47 = vld [vmem:[%s1536_s5 + $0x20] sm:$0xff] (!%p239_p2)  ;;  %v709_v48 = vld [vmem:[%s1536_s5 + $0x28] sm:$0xff] (!%p239_p2)  ;;  %v710_v50 = vld [vmem:[%s1536_s5 + $0x30] sm:$0xff] (!%p239_p2) }
   0xd   : > { %s1540_s28 = smov (!%p271_p3, %s966_s28), 31  ;;  %v1251_v49 = vpack.c.bf16 %v709_v48, %v708_v47  ;;  %v711_v51 = vld [vmem:[%s1536_s5 + $0x38] sm:$0xff]  ;;  %v712_v53 = vld [vmem:[%s1536_s5 + $0x40] sm:$0xff]  ;;  %v713_v54 = vld [vmem:[%s1536_s5 + $0x48] sm:$0xff] }
   0xe   : > { %s967_s18 = sshll.u32 %s1540_s28, 3  ;;  %1218 = vmatpush3.bf16.msra.mxu1 %v1215_v6  ;;  %1244 = vmatprep.subr.bf16.mxu0 %v1243_v44  ;;  %v1255_v52 = vpack.c.bf16 %v711_v51, %v710_v50  ;;  %v1259_v55 = vpack.c.bf16 %v713_v54, %v712_v53  ;;  %v714_v56 = vld [vmem:[%s1536_s5 + $0x50] sm:$0xff]  ;;  %v715_v57 = vld [vmem:[%s1536_s5 + $0x58] sm:$0xff]  ;;  %v716_v59 = vld [vmem:[%s1536_s5 + $0x60] sm:$0xff] }
   0xf   : > { %s1368_s21 = scalar_lea.vmem %s1531_s0, %s967_s18  ;;  %1220 = vmatprep.subr.bf16.mxu1 %v1219_v9  ;;  %v1263_v58 = vpack.c.bf16 %v715_v57, %v714_v56  ;;  %v717_v60 = vld [vmem:[%s1536_s5 + $0x68] sm:$0xff]  ;;  %v970_v62 = vld [vmem:[%s1533_s2] ss:$0 sm:$0xff]  ;;  %v718_v47 = vld [vmem:[%s1536_s5 + $0x70] sm:$0xff]  ;;  %s1494_s23 = scalar_lea.vmem %s1538_s7, %s967_s18 }
  0x10   : > { %v282_v12 = vld [vmem:[%s1368_s21] sm:$0xff]  ;;  %v283_v13 = vld [vmem:[%s1368_s21 + $0x8] sm:$0xff]  ;;  %v284_v14 = vld [vmem:[%s1368_s21 + $0x10] sm:$0xff]  ;;  %v1267_v61 = vpack.c.bf16 %v717_v60, %v716_v59 }
  0x11   : > { %1075 = vmatprep.mubr.msk.f32.mxu0 %vm306_vm1, %v282_v12  ;;  %v285_v15 = vld [vmem:[%s1368_s21 + $0x18] sm:$0xff]  ;;  %v286_v17 = vld [vmem:[%s1368_s21 + $0x20] sm:$0xff]  ;;  %v287_v20 = vld [vmem:[%s1368_s21 + $0x28] sm:$0xff] }
  0x12   : > { %1076 = vmatmul.mubr.msk.f32.vlgmr.msra.gmra.mrb[0].mxu0 %vm306_vm1, %v283_v13  ;;  %1222 = vmatpush3.bf16.msra.mxu1 %v1219_v9  ;;  %v288_v22 = vld [vmem:[%s1368_s21 + $0x30] sm:$0xff]  ;;  %v289_v25 = vld [vmem:[%s1368_s21 + $0x38] sm:$0xff]  ;;  %v290_v27 = vld [vmem:[%s1368_s21 + $0x40] sm:$0xff] }
  0x13   : > { %1078 = vmatprep.mubr.msk.f32.mxu0 %vm306_vm1, %v284_v14  ;;  %1224 = vmatprep.subr.bf16.mxu1 %v1223_v16  ;;  %v291_v30 = vld [vmem:[%s1368_s21 + $0x48] sm:$0xff]  ;;  %v292_v32 = vld [vmem:[%s1368_s21 + $0x50] sm:$0xff]  ;;  %v293_v33 = vld [vmem:[%s1368_s21 + $0x58] sm:$0xff] }
  0x14   : > { %v294_v34 = vld [vmem:[%s1368_s21 + $0x60] sm:$0xff]  ;;  %v295_v35 = vld [vmem:[%s1368_s21 + $0x68] sm:$0xff]  ;;  %v296_v36 = vld [vmem:[%s1368_s21 + $0x70] sm:$0xff]  ;;  %1246 = vmatpush3.bf16.msra.mxu0 %v1243_v44 }
  0x15   : > { %v297_v37 = vld [vmem:[%s1368_s21 + $0x78] sm:$0xff]  ;;  %1248 = vmatprep.subr.bf16.mxu0 %v1247_v46  ;;  %v988_v50 = vld [vmem:[%s1535_s4] ss:$0 sm:$0xff] }
  0x16   : > { %1079 = vmatmul.mubr.msk.f32.gmra.mrb[2].mxu0 %vm306_vm1, %v285_v15  ;;  %1226 = vmatpush3.bf16.msra.mxu1 %v1223_v16  ;;  %v719_v48 = vld [vmem:[%s1536_s5 + $0x78] sm:$0xff] }
  0x17   : > { %1081 = vmatprep.mubr.msk.f32.mxu0 %vm306_vm1, %v286_v17  ;;  %1228 = vmatprep.subr.bf16.mxu1 %v1227_v21 }
  0x18   : > { %1250 = vmatpush3.bf16.msra.mxu0 %v1247_v46 }
  0x19   : > { %1252 = vmatprep.subr.bf16.mxu0 %v1251_v49 }
  0x1a   : > { %1082 = vmatmul.mubr.msk.f32.gmra.mrb[4].mxu0 %vm306_vm1, %v287_v20  ;;  %1230 = vmatpush3.bf16.msra.mxu1 %v1227_v21 }
  0x1b   : > { %1084 = vmatprep.mubr.msk.f32.mxu0 %vm306_vm1, %v288_v22  ;;  %1232 = vmatprep.subr.bf16.mxu1 %v1231_v26 }
  0x1c   : > { %1254 = vmatpush3.bf16.msra.mxu0 %v1251_v49  ;;  %v1271_v49 = vpack.c.bf16 %v719_v48, %v718_v47 }
  0x1d   : > { %1256 = vmatprep.subr.bf16.mxu0 %v1255_v52 }
  0x1e   : > { %1085 = vmatmul.mubr.msk.f32.gmra.mrb[6].mxu0 %vm306_vm1, %v289_v25  ;;  %1234 = vmatpush3.bf16.msra.mxu1 %v1231_v26 }
  0x1f   : > { %1087 = vmatprep.mubr.msk.f32.mxu0 %vm306_vm1, %v290_v27  ;;  %1236 = vmatprep.subr.bf16.mxu1 %v1235_v31 }
  0x20   : > { %1258 = vmatpush3.bf16.msra.mxu0 %v1255_v52 }
  0x21   : > { %1260 = vmatprep.subr.bf16.mxu0 %v1259_v55 }
  0x22   : > { %1088 = vmatmul.mubr.msk.f32.gmra.mrb[8].mxu0 %vm306_vm1, %v291_v30  ;;  %1238 = vmatpush3.bf16.msra.mxu1 %v1235_v31 }
  0x23   : > { %1090 = vmatprep.mubr.msk.f32.mxu0 %vm306_vm1, %v292_v32  ;;  %1240 = vmatprep.subr.bf16.mxu1 %v1239_v40 }
  0x24   : > { %1262 = vmatpush3.bf16.msra.mxu0 %v1259_v55 }
  0x25   : > { %1264 = vmatprep.subr.bf16.mxu0 %v1263_v58 }
  0x26   : > { %1091 = vmatmul.mubr.msk.f32.gmra.mrb[10].mxu0 %vm306_vm1, %v293_v33  ;;  %1242 = vmatpush3.bf16.msra.mxu1 %v1239_v40 }
  0x27   : > { %1093 = vmatprep.mubr.msk.f32.mxu0 %vm306_vm1, %v294_v34 }
  0x28   : > { %1266 = vmatpush3.bf16.msra.mxu0 %v1263_v58 }
  0x29   : > { %1268 = vmatprep.subr.bf16.mxu0 %v1267_v61 }
  0x2a   : > { %1094 = vmatmul.mubr.msk.f32.gmra.mrb[12].mxu0 %vm306_vm1, %v295_v35 }
  0x2b   : > { %1096 = vmatprep.mubr.msk.f32.mxu0 %vm306_vm1, %v296_v36 }
  0x2c   : > { %1270 = vmatpush3.bf16.msra.mxu0 %v1267_v61 }
  0x2d   : > { %1272 = vmatprep.subr.bf16.mxu0 %v1271_v49 }
  0x2e   : > { %1097 = vmatmul.mubr.msk.f32.gmra.mrb[14].mxu0 %vm306_vm1, %v297_v37 }
  0x30   : > { %1274 = vmatpush3.bf16.msra.mxu0 %v1271_v49 }
  0xe5   : > { %v1077_v63 = vpop.f32.mrb[0].mxu0 }
  0xe6   : > { %v431_v0 = vadd.f32 %v1077_v63, %v970_v62  ;;  %v425_v1 = vpop.f32.mrb[1].mxu0 }
  0xe7   : > { %v426_v2 = vadd.f32 %v970_v62, %v425_v1 }
  0xe8   : > { %v505_v5 = vmax.f32 %v431_v0, 0.0 }
  0xe9   : > { %v1080_v3 = vpop.f32.mrb[2].mxu0  ;;  %v504_v4 = vmax.f32 %v426_v2, 0.0 }
  0xea   : > { %v441_v6 = vadd.f32 %v1080_v3, %v970_v62  ;;  %v435_v7 = vpop.f32.mrb[3].mxu0 }
  0xeb   : > { %v436_v8 = vadd.f32 %v970_v62, %v435_v7  ;;  %1131 = vmatprep.mubr.f32.mxu1 %v504_v4 }
  0xec   : > { %1132 = vmatmul.mubr.f32.vlgmr.msra.gmra.mrb[0].mxu1 %v505_v5  ;;  %v507_v11 = vmax.f32 %v441_v6, 0.0 }
  0xed   : > { %v506_v9 = vmax.f32 %v436_v8, 0.0  ;;  %v1083_v10 = vpop.f32.mrb[4].mxu0 }
  0xee   : > { %v451_v12 = vadd.f32 %v1083_v10, %v970_v62  ;;  %v445_v13 = vpop.f32.mrb[5].mxu0 }
  0xef   : > { %v446_v14 = vadd.f32 %v970_v62, %v445_v13  ;;  %1134 = vmatprep.mubr.f32.mxu1 %v506_v9 }
  0xf0   : > { %1135 = vmatmul.mubr.f32.gmra.mrb[2].mxu1 %v507_v11  ;;  %v509_v17 = vmax.f32 %v451_v12, 0.0 }
  0xf1   : > { %v508_v15 = vmax.f32 %v446_v14, 0.0  ;;  %v1086_v16 = vpop.f32.mrb[6].mxu0 }
  0xf2   : > { %v461_v18 = vadd.f32 %v1086_v16, %v970_v62  ;;  %v455_v19 = vpop.f32.mrb[7].mxu0 }
  0xf3   : > { %v456_v20 = vadd.f32 %v970_v62, %v455_v19  ;;  %1137 = vmatprep.mubr.f32.mxu1 %v508_v15 }
  0xf4   : > { %1138 = vmatmul.mubr.f32.gmra.mrb[4].mxu1 %v509_v17  ;;  %v511_v23 = vmax.f32 %v461_v18, 0.0 }
  0xf5   : > { %v510_v21 = vmax.f32 %v456_v20, 0.0  ;;  %v1089_v22 = vpop.f32.mrb[8].mxu0 }
  0xf6   : > { %v471_v24 = vadd.f32 %v1089_v22, %v970_v62  ;;  %v465_v25 = vpop.f32.mrb[9].mxu0 }
  0xf7   : > { %v466_v26 = vadd.f32 %v970_v62, %v465_v25  ;;  %1140 = vmatprep.mubr.f32.mxu1 %v510_v21 }
  0xf8   : > { %1141 = vmatmul.mubr.f32.gmra.mrb[6].mxu1 %v511_v23  ;;  %v513_v29 = vmax.f32 %v471_v24, 0.0 }
  0xf9   : > { %v512_v27 = vmax.f32 %v466_v26, 0.0  ;;  %v1092_v28 = vpop.f32.mrb[10].mxu0 }
  0xfa   : > { %v481_v30 = vadd.f32 %v1092_v28, %v970_v62  ;;  %v475_v31 = vpop.f32.mrb[11].mxu0 }
  0xfb   : > { %v476_v32 = vadd.f32 %v970_v62, %v475_v31  ;;  %1143 = vmatprep.mubr.f32.mxu1 %v512_v27 }
  0xfc   : > { %1144 = vmatmul.mubr.f32.gmra.mrb[8].mxu1 %v513_v29  ;;  %v515_v35 = vmax.f32 %v481_v30, 0.0 }
  0xfd   : > { %v514_v33 = vmax.f32 %v476_v32, 0.0  ;;  %v1095_v34 = vpop.f32.mrb[12].mxu0 }
  0xfe   : > { %v491_v36 = vadd.f32 %v1095_v34, %v970_v62  ;;  %v485_v37 = vpop.f32.mrb[13].mxu0 }
  0xff   : > { %v486_v38 = vadd.f32 %v970_v62, %v485_v37  ;;  %1146 = vmatprep.mubr.f32.mxu1 %v514_v33 }
 0x100   : > { %1147 = vmatmul.mubr.f32.gmra.mrb[10].mxu1 %v515_v35  ;;  %v517_v41 = vmax.f32 %v491_v36, 0.0  ;;  %v989_v35 = vld [vmem:[%s1537_s6] ss:$0 sm:$0xff] }
 0x101   : > { %v516_v39 = vmax.f32 %v486_v38, 0.0  ;;  %v1098_v40 = vpop.f32.mrb[14].mxu0 }
 0x102   : > { %v501_v42 = vadd.f32 %v1098_v40, %v970_v62  ;;  %v495_v43 = vpop.f32.mrb[15].mxu0 }
 0x103   : > { %v496_v44 = vadd.f32 %v970_v62, %v495_v43  ;;  %1149 = vmatprep.mubr.f32.mxu1 %v516_v39 }
 0x104   : > { %1150 = vmatmul.mubr.f32.gmra.mrb[12].mxu1 %v517_v41  ;;  %v519_v46 = vmax.f32 %v501_v42, 0.0 }
 0x105   : > { %v518_v45 = vmax.f32 %v496_v44, 0.0 }
 0x107   : > { %1152 = vmatprep.mubr.f32.mxu1 %v518_v45 }
 0x108   : > { %1153 = vmatmul.mubr.f32.gmra.mrb[14].mxu1 %v519_v46 }
 0x1bf   : > { %v1133_v51 = vpop.f32.mrb[0].mxu1 }
 0x1c0   : > { %v615_v52 = vadd.f32 %v1133_v51, %v988_v50  ;;  %v609_v53 = vpop.f32.mrb[1].mxu1 }
 0x1c1   : > { %v610_v54 = vadd.f32 %v988_v50, %v609_v53 }
 0x1c2   : > { %v689_v57 = vmax.f32 %v615_v52, 0.0 }
 0x1c3   : > { %v688_v55 = vmax.f32 %v610_v54, 0.0  ;;  %v1136_v56 = vpop.f32.mrb[2].mxu1 }
 0x1c4   : > { %v625_v58 = vadd.f32 %v1136_v56, %v988_v50  ;;  %v619_v59 = vpop.f32.mrb[3].mxu1 }
 0x1c5   : > { %v620_v60 = vadd.f32 %v988_v50, %v619_v59  ;;  %1187 = vmatprep.mubr.f32.mxu0 %v688_v55 }
 0x1c6   : > { %1188 = vmatmul.mubr.f32.vlgmr.msra.gmra.mrb[16].mxu0 %v689_v57  ;;  %v691_v63 = vmax.f32 %v625_v58, 0.0 }
 0x1c7   : > { %v690_v61 = vmax.f32 %v620_v60, 0.0  ;;  %v1139_v62 = vpop.f32.mrb[4].mxu1 }
 0x1c8   : > { %v635_v0 = vadd.f32 %v1139_v62, %v988_v50  ;;  %v629_v1 = vpop.f32.mrb[5].mxu1 }
 0x1c9   : > { %v630_v2 = vadd.f32 %v988_v50, %v629_v1  ;;  %1190 = vmatprep.mubr.f32.mxu0 %v690_v61 }
 0x1ca   : > { %1191 = vmatmul.mubr.f32.gmra.mrb[18].mxu0 %v691_v63  ;;  %v693_v5 = vmax.f32 %v635_v0, 0.0 }
 0x1cb   : > { %v692_v3 = vmax.f32 %v630_v2, 0.0  ;;  %v1142_v4 = vpop.f32.mrb[6].mxu1 }
 0x1cc   : > { %v645_v6 = vadd.f32 %v1142_v4, %v988_v50  ;;  %v639_v7 = vpop.f32.mrb[7].mxu1 }
 0x1cd   : > { %v640_v8 = vadd.f32 %v988_v50, %v639_v7  ;;  %1193 = vmatprep.mubr.f32.mxu0 %v692_v3 }
 0x1ce   : > { %1194 = vmatmul.mubr.f32.gmra.mrb[20].mxu0 %v693_v5  ;;  %v695_v11 = vmax.f32 %v645_v6, 0.0 }
 0x1cf   : > { %v694_v9 = vmax.f32 %v640_v8, 0.0  ;;  %v1145_v10 = vpop.f32.mrb[8].mxu1 }
 0x1d0   : > { %v655_v12 = vadd.f32 %v1145_v10, %v988_v50  ;;  %v649_v13 = vpop.f32.mrb[9].mxu1 }
 0x1d1   : > { %v650_v14 = vadd.f32 %v988_v50, %v649_v13  ;;  %1196 = vmatprep.mubr.f32.mxu0 %v694_v9 }
 0x1d2   : > { %1197 = vmatmul.mubr.f32.gmra.mrb[22].mxu0 %v695_v11  ;;  %v697_v17 = vmax.f32 %v655_v12, 0.0 }
 0x1d3   : > { %v696_v15 = vmax.f32 %v650_v14, 0.0  ;;  %v1148_v16 = vpop.f32.mrb[10].mxu1 }
 0x1d4   : > { %v665_v18 = vadd.f32 %v1148_v16, %v988_v50  ;;  %v659_v19 = vpop.f32.mrb[11].mxu1 }
 0x1d5   : > { %v660_v20 = vadd.f32 %v988_v50, %v659_v19  ;;  %1199 = vmatprep.mubr.f32.mxu0 %v696_v15 }
 0x1d6   : > { %1200 = vmatmul.mubr.f32.gmra.mrb[24].mxu0 %v697_v17  ;;  %v699_v23 = vmax.f32 %v665_v18, 0.0 }
 0x1d7   : > { %v698_v21 = vmax.f32 %v660_v20, 0.0  ;;  %v1151_v22 = vpop.f32.mrb[12].mxu1 }
 0x1d8   : > { %v675_v24 = vadd.f32 %v1151_v22, %v988_v50  ;;  %v669_v25 = vpop.f32.mrb[13].mxu1 }
 0x1d9   : > { %v670_v26 = vadd.f32 %v988_v50, %v669_v25  ;;  %1202 = vmatprep.mubr.f32.mxu0 %v698_v21 }
 0x1da   : > { %1203 = vmatmul.mubr.f32.gmra.mrb[26].mxu0 %v699_v23  ;;  %v701_v29 = vmax.f32 %v675_v24, 0.0 }
 0x1db   : > { %v700_v27 = vmax.f32 %v670_v26, 0.0  ;;  %v1154_v28 = vpop.f32.mrb[14].mxu1 }
 0x1dc   : > { %v685_v30 = vadd.f32 %v1154_v28, %v988_v50  ;;  %v679_v31 = vpop.f32.mrb[15].mxu1 }
 0x1dd   : > { %v680_v32 = vadd.f32 %v988_v50, %v679_v31  ;;  %1205 = vmatprep.mubr.f32.mxu0 %v700_v27 }
 0x1de   : > { %1206 = vmatmul.mubr.f32.gmra.mrb[28].mxu0 %v701_v29  ;;  %v703_v34 = vmax.f32 %v685_v30, 0.0 }
 0x1df   : > { %v702_v33 = vmax.f32 %v680_v32, 0.0 }
 0x1e1   : > { %1208 = vmatprep.mubr.f32.mxu0 %v702_v33 }
 0x1e2   : > { %1209 = vmatmul.mubr.f32.gmra.mrb[30].mxu0 %v703_v34 }
 0x299   : > { %v1189_v36 = vpop.f32.mrb[16].mxu0 }
 0x29a   : > { %v799_v37 = vadd.f32 %v1189_v36, %v989_v35  ;;  %v793_v38 = vpop.f32.mrb[17].mxu0 }
 0x29b   : > { %v794_v39 = vadd.f32 %v989_v35, %v793_v38 }
 0x29c   : > { %v873_v40 = vmax.f32 %v799_v37, 0.0 }
 0x29d   : > { %v872_v41 = vmax.f32 %v794_v39, 0.0  ;;  %v1192_v42 = vpop.f32.mrb[18].mxu0 }
 0x29e   : > { %890 = vst.msk [vmem:[%s1494_s23 + $0x8] sm:$0xff] %vm888_vm2, %v873_v40  ;;  %v809_v43 = vadd.f32 %v1192_v42, %v989_v35  ;;  %v803_v44 = vpop.f32.mrb[19].mxu0 }
 0x29f   : > { %889 = vst.msk [vmem:[%s1494_s23] sm:$0xff] %vm888_vm2, %v872_v41  ;;  %v804_v45 = vadd.f32 %v989_v35, %v803_v44 }
 0x2a0   : > { %v875_v46 = vmax.f32 %v809_v43, 0.0 }
 0x2a1   : > { %v874_v47 = vmax.f32 %v804_v45, 0.0  ;;  %v1195_v48 = vpop.f32.mrb[20].mxu0 }
 0x2a2   : > { %892 = vst.msk [vmem:[%s1494_s23 + $0x18] sm:$0xff] %vm888_vm2, %v875_v46  ;;  %v819_v49 = vadd.f32 %v1195_v48, %v989_v35  ;;  %v813_v50 = vpop.f32.mrb[21].mxu0 }
 0x2a3   : > { %891 = vst.msk [vmem:[%s1494_s23 + $0x10] sm:$0xff] %vm888_vm2, %v874_v47  ;;  %v814_v51 = vadd.f32 %v989_v35, %v813_v50 }
 0x2a4   : > { %v877_v52 = vmax.f32 %v819_v49, 0.0 }
 0x2a5   : > { %v876_v53 = vmax.f32 %v814_v51, 0.0  ;;  %v1198_v54 = vpop.f32.mrb[22].mxu0 }
 0x2a6   : > { %894 = vst.msk [vmem:[%s1494_s23 + $0x28] sm:$0xff] %vm888_vm2, %v877_v52  ;;  %v829_v55 = vadd.f32 %v1198_v54, %v989_v35  ;;  %v823_v56 = vpop.f32.mrb[23].mxu0 }
 0x2a7   : > { %893 = vst.msk [vmem:[%s1494_s23 + $0x20] sm:$0xff] %vm888_vm2, %v876_v53  ;;  %v824_v57 = vadd.f32 %v989_v35, %v823_v56 }
 0x2a8   : > { %v879_v58 = vmax.f32 %v829_v55, 0.0 }
 0x2a9   : > { %v878_v59 = vmax.f32 %v824_v57, 0.0  ;;  %v1201_v60 = vpop.f32.mrb[24].mxu0 }
 0x2aa   : > { %896 = vst.msk [vmem:[%s1494_s23 + $0x38] sm:$0xff] %vm888_vm2, %v879_v58  ;;  %v839_v61 = vadd.f32 %v1201_v60, %v989_v35  ;;  %v833_v62 = vpop.f32.mrb[25].mxu0 }
 0x2ab   : > { %895 = vst.msk [vmem:[%s1494_s23 + $0x30] sm:$0xff] %vm888_vm2, %v878_v59  ;;  %v834_v63 = vadd.f32 %v989_v35, %v833_v62 }
 0x2ac   : > { %v881_v0 = vmax.f32 %v839_v61, 0.0 }
 0x2ad   : > { %v880_v1 = vmax.f32 %v834_v63, 0.0  ;;  %v1204_v2 = vpop.f32.mrb[26].mxu0 }
 0x2ae   : > { %898 = vst.msk [vmem:[%s1494_s23 + $0x48] sm:$0xff] %vm888_vm2, %v881_v0  ;;  %v849_v3 = vadd.f32 %v1204_v2, %v989_v35  ;;  %v843_v4 = vpop.f32.mrb[27].mxu0 }
 0x2af   : > { %897 = vst.msk [vmem:[%s1494_s23 + $0x40] sm:$0xff] %vm888_vm2, %v880_v1  ;;  %v844_v5 = vadd.f32 %v989_v35, %v843_v4 }
 0x2b0   : > { %v883_v6 = vmax.f32 %v849_v3, 0.0 }
 0x2b1   : > { %v882_v7 = vmax.f32 %v844_v5, 0.0  ;;  %v1207_v8 = vpop.f32.mrb[28].mxu0 }
 0x2b2   : > { %900 = vst.msk [vmem:[%s1494_s23 + $0x58] sm:$0xff] %vm888_vm2, %v883_v6  ;;  %v859_v9 = vadd.f32 %v1207_v8, %v989_v35  ;;  %v853_v10 = vpop.f32.mrb[29].mxu0 }
 0x2b3   : > { %899 = vst.msk [vmem:[%s1494_s23 + $0x50] sm:$0xff] %vm888_vm2, %v882_v7  ;;  %v854_v11 = vadd.f32 %v989_v35, %v853_v10 }
 0x2b4   : > { %v885_v12 = vmax.f32 %v859_v9, 0.0 }
 0x2b5   : > { %v884_v13 = vmax.f32 %v854_v11, 0.0  ;;  %v1210_v14 = vpop.f32.mrb[30].mxu0 }
 0x2b6   : > { %902 = vst.msk [vmem:[%s1494_s23 + $0x68] sm:$0xff] %vm888_vm2, %v885_v12  ;;  %v869_v15 = vadd.f32 %v1210_v14, %v989_v35  ;;  %v863_v16 = vpop.f32.mrb[31].mxu0 }
 0x2b7   : > { %901 = vst.msk [vmem:[%s1494_s23 + $0x60] sm:$0xff] %vm888_vm2, %v884_v13  ;;  %v864_v17 = vadd.f32 %v989_v35, %v863_v16 }
 0x2b8   : > { %v887_v18 = vmax.f32 %v869_v15, 0.0 }
 0x2b9   : > { %v886_v19 = vmax.f32 %v864_v17, 0.0 }
 0x2ba   : > { %904 = vst.msk [vmem:[%s1494_s23 + $0x78] sm:$0xff] %vm888_vm2, %v887_v18 }
 0x2bb   : > { %903 = vst.msk [vmem:[%s1494_s23 + $0x70] sm:$0xff] %vm888_vm2, %v886_v19 }
 0x2bc PF: > { %s17_s24 = sadd.s32 1, %s1289_s24  }
 0x2bd   : > { %p14_p4 = scmp.ge.s32.totalorder %s17_s24, 4  }
 0x2bf   :  { %16 = sbr.rel (!%p14_p4) target bundleno = 1 (0x1), region = 78 }

</bundles_post_ra>
